<compile_context>
chip_gen: v7x
topology: tpu7x:2x2x1
jax: 0.10.0
libtpu: 0.0.40
codegen_flags: <defaults>
</compile_context>

<pallas_src>
import jax
import jax.numpy as jnp
from jax.experimental import pallas as pl
from jax.experimental.pallas import tpu as pltpu

_LANE = 128
_MIN_PALLAS_C = 32  # below this, most output-store lanes are masked -> use XLA


def _transpose_tile_kernel(x_ref, o_ref):
    # x_ref: (C, T) tile of the NCHW input;  o_ref: (T, C) tile of the NHWC output.
    o_ref[...] = x_ref[...].T


def _vmem_budget():
    """Generation-aware (per_side_tile_cap_bytes, vmem_limit_bytes)."""
    try:
        vmem_cap = int(pltpu.get_tpu_info().vmem_capacity_bytes)
    except Exception:
        vmem_cap = 0
    if vmem_cap and vmem_cap <= 80 * 1024 * 1024:
        # v7x-class: 64 MiB VMEM per TensorCore, ~3.2 TB/s HBM.  Large tiles
        # to amortize the ~0.35us per-step overhead, but leave headroom:
        # 2 sides x 2 buffers x 7 MiB = 28 MiB << 44 MiB limit << 64 MiB.
        return 7 * 1024 * 1024, 44 * 1024 * 1024
    if vmem_cap:
        # v5e/v6e-class: 128 MiB physical VMEM.  The scoped default is only
        # 16/32 MiB, so the explicit limit here is load-bearing.
        # 2 sides x 2 buffers x 10 MiB = 40 MiB << 56 MiB limit << 128 MiB.
        return 10 * 1024 * 1024, 56 * 1024 * 1024
    # Unknown hardware: conservative settings that fit every generation.
    return 6 * 1024 * 1024, 44 * 1024 * 1024


def _choose_spatial_tile(hw, c, itemsize, max_tile_bytes):
    """Largest lane-aligned (128-multiple) spatial tile under the VMEM budget.

    No divisibility requirement: grid = cdiv(HW, T); Pallas pads reads and
    masks writes of the ragged final block.
    """
    if hw <= _LANE:
        return hw  # full extent (allowed even when not a 128-multiple)
    cap_elems = max(_LANE, max_tile_bytes // max(1, c * itemsize))
    t = max(_LANE, (cap_elems // _LANE) * _LANE)
    return min(t, (hw // _LANE) * _LANE)


def _nchw_to_nhwc_impl(x, max_tile_bytes, vmem_limit_bytes):
    B, C, H, W = x.shape
    HW = H * W
    itemsize = jnp.dtype(x.dtype).itemsize

    x2 = x.reshape(B, C, HW)  # free view: NCHW is contiguous
    T = _choose_spatial_tile(HW, C, itemsize, max_tile_bytes)
    # v7x megacore: with B == 1, split the spatial axis so both TensorCores
    # get at least one block.
    if B == 1 and HW > 2 * _LANE and pl.cdiv(HW, T) < 2:
        T = max(_LANE, ((pl.cdiv(HW, 2) + _LANE - 1) // _LANE) * _LANE)
    grid = (B, pl.cdiv(HW, T))

    out2 = pl.pallas_call(
        _transpose_tile_kernel,
        out_shape=jax.ShapeDtypeStruct((B, HW, C), x.dtype),
        grid_spec=pltpu.PrefetchScalarGridSpec(
            num_scalar_prefetch=0,
            grid=grid,
            # None squeezes the batch dim: the kernel sees clean 2D tiles.
            in_specs=[pl.BlockSpec((None, C, T), lambda b, s: (b, 0, s))],
            out_specs=pl.BlockSpec((None, T, C), lambda b, s: (b, s, 0)),
        ),
        compiler_params=pltpu.CompilerParams(
            dimension_semantics=("parallel", "parallel"),
            vmem_limit_bytes=vmem_limit_bytes,
        ),
        cost_estimate=pl.CostEstimate(
            flops=0,
            transcendentals=0,
            bytes_accessed=2 * x.size * itemsize,
        ),
    )(x2)
    return out2.reshape(B, H, W, C)  # free view: NHWC is contiguous


_nchw_to_nhwc_jit = jax.jit(_nchw_to_nhwc_impl, static_argnums=(1, 2))


def _nchw_to_nhwc(x, max_tile_bytes=None, vmem_limit_bytes=None):
    cap, limit = _vmem_budget()
    return _nchw_to_nhwc_jit(
        x, int(max_tile_bytes or cap), int(vmem_limit_bytes or limit))


def permute_pallas(x, perm, *, force_pallas=False):
    """Pallas-backed equivalent of torch.Tensor.permute(*perm)."""
    perm = tuple(int(p) for p in perm)
    if perm == tuple(range(x.ndim)):
        return x
    if x.ndim == 4 and perm == (0, 2, 3, 1):
        C = x.shape[1]
        # For C far below one lane (128), the (HW, C) output would leave most
        # of every store masked; let XLA handle it unless explicitly forced.
        if force_pallas or C >= _MIN_PALLAS_C:
            return _nchw_to_nhwc(x)
    # TODO(synk): only the RSMamba permutation (0, 2, 3, 1) has a dedicated
    # Pallas kernel; other permutations use XLA's transpose.
    return jnp.transpose(x, perm)


if __name__ == "__main__":
    key = jax.random.PRNGKey(0)
    k0, k1 = jax.random.split(key)
    perm = (0, 2, 3, 1)  # Permute(0, 2, 3, 1): NCHW -> NHWC

    # 1) Primary shape from the RSMamba usage/test harness (B, C, H, W).
    #    C=4 is tiny, so exercise the Pallas kernel explicitly (forced) and
    #    also the dispatch wrapper (which falls back to XLA for such small C).
    x = jax.random.normal(k0, (2, 4, 16, 16), dtype=jnp.float32)
    y_ref = jnp.transpose(x, perm)
    y = jax.block_until_ready(permute_pallas(x, perm, force_pallas=True))
    assert y.shape == y_ref.shape and y.dtype == y_ref.dtype
    assert bool(jnp.array_equal(y, y_ref)), "permute mismatch (forced Pallas)"
    y_d = jax.block_until_ready(permute_pallas(x, perm))
    assert bool(jnp.array_equal(y_d, y_ref)), "permute mismatch (dispatch)"

    # 2) Lane-dense channels + spatial size that is NOT a 128-multiple:
    #    exercises the ragged final block (padded reads / masked writes).
    x2 = jax.random.normal(k1, (2, 128, 16, 18), dtype=jnp.float32)  # HW = 288
    y2_ref = jnp.transpose(x2, perm)
    y2 = jax.block_until_ready(permute_pallas(x2, perm))  # default tiles, grid (2, 2)
    assert y2.shape == y2_ref.shape and y2.dtype == y2_ref.dtype
    assert bool(jnp.array_equal(y2, y2_ref)), "permute mismatch (ragged tile)"

    # 3) Shrink the per-tile budget to force several spatial tiles per batch
    #    element (grid (2, 3): two full 128-wide tiles + one ragged 32-wide).
    y3 = jax.block_until_ready(_nchw_to_nhwc(x2, max_tile_bytes=128 * 128 * 4))
    assert bool(jnp.array_equal(y3, y2_ref)), "permute mismatch (multi-tile)"

    print("KERNEL_OK")
</pallas_src>

<mosaic_0001>
module attributes {stable_mosaic.version = 11 : i64} {
  func.func @_transpose_tile_kernel(%arg0: i32, %arg1: i32, %arg2: memref<1x4x256xf32, #tpu.memory_space<vmem>>, %arg3: memref<1x256x4xf32, #tpu.memory_space<vmem>>) attributes {dimension_semantics = [#tpu.dimension_semantics<parallel>, #tpu.dimension_semantics<parallel>], iteration_bounds = array<i64: 2, 1>, scalar_prefetch = 0 : i64, scratch_operands = 0 : i64, tpu.core_type = #tpu.core_type<tc>, window_params = [{transform_indices = @transform_0, window_bounds = array<i64: 1, 4, 256>}, {transform_indices = @transform_1, window_bounds = array<i64: 1, 256, 4>}]} {
    %c0 = arith.constant 0 : index
    %c0_0 = arith.constant 0 : index
    %c0_1 = arith.constant 0 : index
    %0 = vector.load %arg2[%c0, %c0_0, %c0_1] : memref<1x4x256xf32, #tpu.memory_space<vmem>>, vector<1x4x256xf32>
    %1 = vector.shape_cast %0 : vector<1x4x256xf32> to vector<4x256xf32>
    %2 = tpu.transpose %1, [1, 0] : vector<4x256xf32> -> vector<256x4xf32>
    %c0_2 = arith.constant 0 : index
    %c0_3 = arith.constant 0 : index
    %c0_4 = arith.constant 0 : index
    %3 = vector.load %arg3[%c0_2, %c0_3, %c0_4] : memref<1x256x4xf32, #tpu.memory_space<vmem>>, vector<1x256x4xf32>
    %4 = vector.shape_cast %3 : vector<1x256x4xf32> to vector<256x4xf32>
    %5 = vector.shape_cast %2 : vector<256x4xf32> to vector<1x256x4xf32>
    tpu.vector_store %arg3[%c0_2, %c0_3, %c0_4], %5 {strides = array<i32>} : memref<1x256x4xf32, #tpu.memory_space<vmem>>, vector<1x256x4xf32>,
    return
  }
  func.func @transform_0(%arg0: i32, %arg1: i32) -> (i32, i32, i32) {
    %c0_i32 = arith.constant 0 : i32
    %c0_i32_0 = arith.constant 0 : i32
    return %arg0, %c0_i32, %arg1 : i32, i32, i32
  }
  func.func @transform_1(%arg0: i32, %arg1: i32) -> (i32, i32, i32) {
    %c0_i32 = arith.constant 0 : i32
    %c0_i32_0 = arith.constant 0 : i32
    return %arg0, %arg1, %c0_i32 : i32, i32, i32
  }
}

</mosaic_0001>

<bundles_post_ra>
// kernel: _nchw_to_nhwc_impl.1
= control target key start
LH: loop header
LB: loop body
LE: loop exit
PB: predicated region body
PF: predicated region fallthrough
CT: control target
= control target key end

     0   :  { %s417_s6 = smov 0   ;;  %s419_s7 = smov 0   ;;  %s516_s0 = inlined_call_operand.vmem [shape: f32[2,4,256], index: 0, kind: input, shape index: {}]   ;;  %s517_s1 = inlined_call_operand.vmem [shape: f32[2,256,4], index: 1, kind: output, shape index: {}]  }
   0x1   :  { %s421_s8 = smov 0  }
   0x2 LB: > { %s23_s9 = sadd.s32 1, %s401_s7  ;;  %p348_p0 = scmp.ge.s32.totalorder %s405_s8, 1  ;;  %s405_s8 = sphi %s421_s8, %s11_s8   ;;  %s401_s7 = sphi %s419_s7, %s519_s7   ;;  %s397_s6 = sphi %s417_s6, %s518_s6  }
   0x3   : > { %p25_p1 = scmp.ge.s32.totalorder %s23_s9, 2  ;;  %p108_p2 = scmp.lt.s32.totalorder %s405_s8, 3 }
   0x5   : > { %s521_s9 = smov (%p25_p1, %s23_s9), 0  ;;  %p109_p3 = pnand %p348_p0, %p108_p2 }
   0x6   : > { %p137_p4 = scmp.lt.s32.totalorder (!%p109_p3), %s397_s6, 1  ;;  %vm224_vm0 = vcmask (!%p109_p3), 31744  }
   0x7   : > { %112 = sbr.rel (%p109_p3) target bundleno = 272 (0x110), region = 24 }
   0xe   : > { %s523_s6 = smov (!%p137_p4, %s397_s6), 1 }
   0xf   : > { %s355_s10 = sshll.u32 %s523_s6, 3  ;;  %s356_s14 = sshll.u32 %s523_s6, 8 }
  0x10   : > { %s144_s13 = scalar_lea.vmem %s516_s0, %s355_s10  ;;  %s441_s17 = scalar_lea.vmem %s517_s1, %s356_s14 }
  0x11   : > { %v156_v0 = vld [vmem:[%s144_s13] sm:$0xff] }
  0x12   : > { %160 = vxpose.xlu0.b32.start.end [1/1] (short) %v156_v0, 128  ;;  %v158_v1 = vcombine.high %v156_v0, %v156_v0 }
  0x4f   : > { %192 = vxpose.xlu0.b32.start.end [1/1] (short) %v158_v1, 128 }
  0x92   : > { %v176_v2 = vpop.trf.xlu0 }
  0x93   : > { %225 = vst.msk [vmem:[%s441_s17] sm:$0xff] %vm224_vm0, %v176_v2 }
  0x96   : > { %v177_v3 = vpop.trf.xlu0 }
  0x97   : > { %226 = vst.msk [vmem:[%s441_s17 + $0x8] sm:$0xff] %vm224_vm0, %v177_v3 }
  0x9a   : > { %v178_v4 = vpop.trf.xlu0 }
  0x9b   : > { %227 = vst.msk [vmem:[%s441_s17 + $0x10] sm:$0xff] %vm224_vm0, %v178_v4 }
  0x9e   : > { %v179_v5 = vpop.trf.xlu0 }
  0x9f   : > { %228 = vst.msk [vmem:[%s441_s17 + $0x18] sm:$0xff] %vm224_vm0, %v179_v5 }
  0xa2   : > { %v180_v6 = vpop.trf.xlu0 }
  0xa3   : > { %229 = vst.msk [vmem:[%s441_s17 + $0x20] sm:$0xff] %vm224_vm0, %v180_v6 }
  0xa6   : > { %v181_v7 = vpop.trf.xlu0 }
  0xa7   : > { %230 = vst.msk [vmem:[%s441_s17 + $0x28] sm:$0xff] %vm224_vm0, %v181_v7 }
  0xaa   : > { %v182_v8 = vpop.trf.xlu0 }
  0xab   : > { %231 = vst.msk [vmem:[%s441_s17 + $0x30] sm:$0xff] %vm224_vm0, %v182_v8 }
  0xae   : > { %v183_v9 = vpop.trf.xlu0 }
  0xaf   : > { %232 = vst.msk [vmem:[%s441_s17 + $0x38] sm:$0xff] %vm224_vm0, %v183_v9 }
  0xb2   : > { %v184_v10 = vpop.trf.xlu0 }
  0xb3   : > { %233 = vst.msk [vmem:[%s441_s17 + $0x40] sm:$0xff] %vm224_vm0, %v184_v10 }
  0xb6   : > { %v185_v11 = vpop.trf.xlu0 }
  0xb7   : > { %234 = vst.msk [vmem:[%s441_s17 + $0x48] sm:$0xff] %vm224_vm0, %v185_v11 }
  0xba   : > { %v186_v12 = vpop.trf.xlu0 }
  0xbb   : > { %235 = vst.msk [vmem:[%s441_s17 + $0x50] sm:$0xff] %vm224_vm0, %v186_v12 }
  0xbe   : > { %v187_v13 = vpop.trf.xlu0 }
  0xbf   : > { %236 = vst.msk [vmem:[%s441_s17 + $0x58] sm:$0xff] %vm224_vm0, %v187_v13 }
  0xc2   : > { %v188_v14 = vpop.trf.xlu0 }
  0xc3   : > { %237 = vst.msk [vmem:[%s441_s17 + $0x60] sm:$0xff] %vm224_vm0, %v188_v14 }
  0xc6   : > { %v189_v15 = vpop.trf.xlu0 }
  0xc7   : > { %238 = vst.msk [vmem:[%s441_s17 + $0x68] sm:$0xff] %vm224_vm0, %v189_v15 }
  0xca   : > { %v190_v16 = vpop.trf.xlu0 }
  0xcb   : > { %239 = vst.msk [vmem:[%s441_s17 + $0x70] sm:$0xff] %vm224_vm0, %v190_v16 }
  0xce   : > { %v191_v17 = vpop.trf.xlu0 }
  0xcf   : > { %240 = vst.msk [vmem:[%s441_s17 + $0x78] sm:$0xff] %vm224_vm0, %v191_v17 }
  0xd2   : > { %v208_v18 = vpop.trf.xlu0 }
  0xd3   : > { %241 = vst.msk [vmem:[%s441_s17 + $0x80] sm:$0xff] %vm224_vm0, %v208_v18 }
  0xd6   : > { %v209_v19 = vpop.trf.xlu0 }
  0xd7   : > { %242 = vst.msk [vmem:[%s441_s17 + $0x88] sm:$0xff] %vm224_vm0, %v209_v19 }
  0xda   : > { %v210_v20 = vpop.trf.xlu0 }
  0xdb   : > { %243 = vst.msk [vmem:[%s441_s17 + $0x90] sm:$0xff] %vm224_vm0, %v210_v20 }
  0xde   : > { %v211_v21 = vpop.trf.xlu0 }
  0xdf   : > { %244 = vst.msk [vmem:[%s441_s17 + $0x98] sm:$0xff] %vm224_vm0, %v211_v21 }
  0xe2   : > { %v212_v22 = vpop.trf.xlu0 }
  0xe3   : > { %245 = vst.msk [vmem:[%s441_s17 + $0xa0] sm:$0xff] %vm224_vm0, %v212_v22 }
  0xe6   : > { %v213_v23 = vpop.trf.xlu0 }
  0xe7   : > { %246 = vst.msk [vmem:[%s441_s17 + $0xa8] sm:$0xff] %vm224_vm0, %v213_v23 }
  0xea   : > { %v214_v24 = vpop.trf.xlu0 }
  0xeb   : > { %247 = vst.msk [vmem:[%s441_s17 + $0xb0] sm:$0xff] %vm224_vm0, %v214_v24 }
  0xee   : > { %v215_v25 = vpop.trf.xlu0 }
  0xef   : > { %248 = vst.msk [vmem:[%s441_s17 + $0xb8] sm:$0xff] %vm224_vm0, %v215_v25 }
  0xf2   : > { %v216_v26 = vpop.trf.xlu0 }
  0xf3   : > { %249 = vst.msk [vmem:[%s441_s17 + $0xc0] sm:$0xff] %vm224_vm0, %v216_v26 }
  0xf6   : > { %v217_v27 = vpop.trf.xlu0 }
  0xf7   : > { %250 = vst.msk [vmem:[%s441_s17 + $0xc8] sm:$0xff] %vm224_vm0, %v217_v27 }
  0xfa   : > { %v218_v28 = vpop.trf.xlu0 }
  0xfb   : > { %251 = vst.msk [vmem:[%s441_s17 + $0xd0] sm:$0xff] %vm224_vm0, %v218_v28 }
  0xfe   : > { %v219_v29 = vpop.trf.xlu0 }
  0xff   : > { %252 = vst.msk [vmem:[%s441_s17 + $0xd8] sm:$0xff] %vm224_vm0, %v219_v29 }
 0x102   : > { %v220_v30 = vpop.trf.xlu0 }
 0x103   : > { %253 = vst.msk [vmem:[%s441_s17 + $0xe0] sm:$0xff] %vm224_vm0, %v220_v30 }
 0x106   : > { %v221_v31 = vpop.trf.xlu0 }
 0x107   : > { %254 = vst.msk [vmem:[%s441_s17 + $0xe8] sm:$0xff] %vm224_vm0, %v221_v31 }
 0x10a   : > { %v222_v32 = vpop.trf.xlu0 }
 0x10b   : > { %255 = vst.msk [vmem:[%s441_s17 + $0xf0] sm:$0xff] %vm224_vm0, %v222_v32 }
 0x10e   : > { %v223_v33 = vpop.trf.xlu0 }
 0x10f   : > { %256 = vst.msk [vmem:[%s441_s17 + $0xf8] sm:$0xff] %vm224_vm0, %v223_v33 }
 0x110 PF: > { %s11_s8 = sadd.s32 1, %s405_s8   ;;  %s518_s6 = smov %s401_s7 }
 0x111   : > { %p8_p5 = scmp.ge.s32.totalorder %s11_s8, 4   ;;  %s519_s7 = smov %s521_s9 }
 0x113   :  { %10 = sbr.rel (!%p8_p5) target bundleno = 2 (0x2), region = 54 }

</bundles_post_ra>
